<compile_context>
chip_gen: v6e
topology: v6e:2x2x1
jax: 0.10.0
libtpu: 0.0.40
codegen_flags: <defaults>
</compile_context>

<pallas_src>
import functools

import jax
import jax.numpy as jnp
from jax.experimental import pallas as pl
from jax.experimental.pallas import tpu as pltpu

HIDDEN = 50            # fixed by the module (nn.Linear(n_features, 50))
HIDDEN_PAD = 128       # lane-dense padded hidden width (zeros: exact)
N_OUT = 2              # (shape, rate)
LANE = 128
CHUNK = 512            # in-kernel sub-tile over batch rows
TILE_B_MAX = 16384     # hard cap on the batch tile (bounds unroll + VMEM)
X_VMEM_BUDGET = 16 * 1024 * 1024   # budget for double-buffered x + out tiles


def _cdiv(a, b):
    return -(-a // b)


def _round_up(n, m):
    return _cdiv(n, m) * m


def _gamma_mlp_kernel(x_ref, w1_ref, b1_ref, w2t_ref, b2_ref, out_ref, *, chunk):
    """One batch tile: out[:, j] = softplus(W2 @ relu(W1 @ x[j] + b1) + b2) + 1e-6.

    x_ref:   [tile_b, F]        (f32 or bf16)
    w1_ref:  [F, 128]           (hidden padded 50 -> 128 with zeros)
    b1_ref:  [1, 128]
    w2t_ref: [2, 128]           (transposed + padded layer_2 weight)
    b2_ref:  [2, 1]
    out_ref: [2, tile_b]        batch on the lane axis -> dense epilogue/store
    """
    tile_b = x_ref.shape[0]
    nc = tile_b // chunk

    # Loop-invariant weights, loaded once per tile (VMEM-resident across grid steps).
    w1 = w1_ref[...]
    b1 = b1_ref[...]
    w2t = w2t_ref[...]
    b2 = b2_ref[...]

    # Static (Python) chunk loop: all slice offsets are compile-time constants.
    for c in range(nc):
        lo, hi = c * chunk, (c + 1) * chunk
        x = x_ref[lo:hi, :]                                          # [chunk, F]

        # Dropout is identity at inference time.
        # layer_1 + ReLU (MXU, f32 accumulation). Padded hidden cols stay 0.
        h = jnp.dot(x, w1, preferred_element_type=jnp.float32) + b1  # [chunk, 128]
        h = jnp.maximum(h, 0.0)

        # layer_2, contracted over the (lane) hidden dim -> [N_OUT, chunk],
        # i.e. batch ends up on the lane axis (dense softplus + dense vst).
        o = jax.lax.dot_general(
            w2t, h, (((1,), (1,)), ((), ())),
            preferred_element_type=jnp.float32) + b2                 # [2, chunk]

        # Numerically stable softplus (matches torch.nn.Softplus, beta=1) + 1e-6.
        out_ref[:, lo:hi] = jax.nn.softplus(o) + 1e-6


def prepare_gamma_params(w1, b1, w2, b2, *, use_bf16_inputs=False):
    """Pad / transpose the parameters once (hoisted out of the per-call path).

    Args:
      w1: [F, 50] (transpose of torch layer_1.weight), b1: [50]
      w2: [50, 2] (transpose of torch layer_2.weight), b2: [2]
      use_bf16_inputs: cast w1 (and x at call time) to bf16 for the MXU; the
        accumulation, biases and softplus stay in f32.
    """
    F, hidden = w1.shape
    assert hidden <= HIDDEN_PAD, f"hidden dim {hidden} > {HIDDEN_PAD} not supported"
    assert b1.shape == (hidden,)
    assert w2.shape == (hidden, N_OUT)
    assert b2.shape == (N_OUT,)

    in_dtype = jnp.bfloat16 if use_bf16_inputs else jnp.float32
    w1p = (jnp.zeros((F, HIDDEN_PAD), jnp.float32)
           .at[:, :hidden].set(w1.astype(jnp.float32)).astype(in_dtype))
    b1p = jnp.zeros((1, HIDDEN_PAD), jnp.float32).at[0, :hidden].set(b1)
    w2t = (jnp.zeros((N_OUT, HIDDEN_PAD), jnp.float32)
           .at[:, :hidden].set(jnp.asarray(w2, jnp.float32).T))
    b2p = jnp.asarray(b2, jnp.float32).reshape(N_OUT, 1)
    return (w1p, b1p, w2t, b2p)


def _select_tiling(B, F, tile_b):
    if tile_b is None:
        # Double-buffered x + out bytes per batch row (f32 upper bound).
        bytes_per_row = 2 * (F + N_OUT) * 4
        cap = max(CHUNK, (X_VMEM_BUDGET // bytes_per_row) // CHUNK * CHUNK)
        cap = min(cap, TILE_B_MAX)
        # Prefer >= 4 grid steps so the "parallel" axis shards across v7x's 2 TCs.
        want = _round_up(_cdiv(B, 4), CHUNK)
        tile_b = min(cap, want)
    else:
        assert tile_b % LANE == 0 or tile_b >= B, "tile_b must be a multiple of 128"
    if tile_b >= B:
        tile_b = B                       # single full block: no masking needed
    grid_b = _cdiv(B, tile_b)

    chunk = tile_b
    for c in (CHUNK, 256, 128):
        if tile_b % c == 0:
            chunk = c
            break
    assert tile_b % chunk == 0
    return tile_b, grid_b, chunk


def gamma_model_forward(x, params, *, tile_b=None):
    """GammaModel forward pass (eval mode).

    Args:
      x: [B, F] float input.
      params: output of prepare_gamma_params.
      tile_b: optional batch-tile override (multiple of 128).

    Returns:
      (shape, rate): each [B] float32 = softplus(layer_2(relu(layer_1(x)))) + 1e-6.
    """
    w1p, b1p, w2t, b2p = params
    B, F = x.shape
    assert w1p.shape == (F, HIDDEN_PAD)

    in_dtype = w1p.dtype
    x = x.astype(in_dtype)

    tile_b, grid_b, chunk = _select_tiling(B, F, tile_b)

    weight_bytes = (F * HIDDEN_PAD * in_dtype.itemsize
                    + (HIDDEN_PAD + HIDDEN_PAD * N_OUT + N_OUT) * 4)
    x_tile_bytes = tile_b * F * in_dtype.itemsize
    out_tile_bytes = N_OUT * tile_b * 4
    h_bytes = chunk * HIDDEN_PAD * 4
    needed = (2 * x_tile_bytes + 2 * out_tile_bytes + 2 * weight_bytes
              + 4 * h_bytes + (2 << 20))
    vmem_limit = int(min(max(needed, 32 << 20), 48 << 20))

    cost = pl.CostEstimate(
        flops=2 * B * (F * HIDDEN_PAD + HIDDEN_PAD * N_OUT),
        transcendentals=2 * B * N_OUT,
        bytes_accessed=B * F * in_dtype.itemsize + N_OUT * B * 4 + weight_bytes,
    )

    out = pl.pallas_call(
        functools.partial(_gamma_mlp_kernel, chunk=chunk),
        out_shape=jax.ShapeDtypeStruct((N_OUT, B), jnp.float32),
        grid=(grid_b,),
        in_specs=[
            pl.BlockSpec((tile_b, F), lambda i: (i, 0)),              # x: streamed
            pl.BlockSpec((F, HIDDEN_PAD), lambda i: (0, 0)),          # w1: resident
            pl.BlockSpec((1, HIDDEN_PAD), lambda i: (0, 0)),          # b1: resident
            pl.BlockSpec((N_OUT, HIDDEN_PAD), lambda i: (0, 0)),      # w2^T: resident
            pl.BlockSpec((N_OUT, 1), lambda i: (0, 0)),               # b2: resident
        ],
        out_specs=pl.BlockSpec((N_OUT, tile_b), lambda i: (0, i)),    # lane-dense out
        compiler_params=pltpu.CompilerParams(
            dimension_semantics=("parallel",),   # megacore sharding on v7x
            vmem_limit_bytes=vmem_limit,
        ),
        cost_estimate=cost,
    )(x, w1p, b1p, w2t, b2p)

    # Head split is a contiguous row slice in this layout.
    return out[0], out[1]


if __name__ == "__main__":
    key = jax.random.PRNGKey(0)
    k_x, k_w1, k_b1, k_w2, k_b2, k_x2, k_x3 = jax.random.split(key, 7)

    n_features = 32
    lim1 = 1.0 / (n_features ** 0.5)
    w1 = jax.random.uniform(k_w1, (n_features, HIDDEN), minval=-lim1, maxval=lim1,
                            dtype=jnp.float32)
    b1 = jax.random.uniform(k_b1, (HIDDEN,), minval=-lim1, maxval=lim1,
                            dtype=jnp.float32)
    lim2 = 1.0 / (HIDDEN ** 0.5)
    w2 = jax.random.uniform(k_w2, (HIDDEN, N_OUT), minval=-lim2, maxval=lim2,
                            dtype=jnp.float32)
    b2 = jax.random.uniform(k_b2, (N_OUT,), minval=-lim2, maxval=lim2,
                            dtype=jnp.float32)

    params_f32 = prepare_gamma_params(w1, b1, w2, b2)
    fwd = jax.jit(gamma_model_forward, static_argnames=("tile_b",))

    def reference(x):
        h = jnp.maximum(x @ w1 + b1, 0.0)
        o = jax.nn.softplus(h @ w2 + b2) + 1e-6
        return o[:, 0], o[:, 1]

    def check(x, tile_b=None, params=params_f32, rtol=1e-5, atol=1e-5):
        s, r = fwd(x, params, tile_b=tile_b)
        jax.block_until_ready((s, r))
        s_ref, r_ref = reference(x)
        assert s.shape == (x.shape[0],) and r.shape == (x.shape[0],)
        assert jnp.allclose(s, s_ref, rtol=rtol, atol=atol)
        assert jnp.allclose(r, r_ref, rtol=rtol, atol=atol)
        assert bool(jnp.all(s > 0)) and bool(jnp.all(r > 0))

    # 1) tiny batch -> single full block (block == full array, no masking).
    x_small = jax.random.normal(k_x, (20, n_features), dtype=jnp.float32)
    check(x_small)

    # 2) ragged multi-step grid: 300 rows with 128-row tiles -> 3 grid steps,
    #    last block masked (exercises the streamed, lane-dense-output path).
    x_med = jax.random.normal(k_x2, (300, n_features), dtype=jnp.float32)
    check(x_med, tile_b=128)

    # 3) auto tiling with multi-chunk inner loop (tile 1024, chunk 512, ragged tail).
    x_big = jax.random.normal(k_x3, (3000, n_features), dtype=jnp.float32)
    check(x_big)

    # 4) optional bf16 x/w1 path (bf16 only on the MXU inputs -> looser tolerance).
    params_bf16 = prepare_gamma_params(w1, b1, w2, b2, use_bf16_inputs=True)
    check(x_med, tile_b=128, params=params_bf16, rtol=5e-2, atol=5e-2)

    print("KERNEL_OK")
</pallas_src>

<mosaic_0001>
module attributes {stable_mosaic.version = 11 : i64} {
  func.func @_gamma_mlp_kernel(%arg0: i32, %arg1: memref<20x32xf32, #tpu.memory_space<vmem>>, %arg2: memref<32x128xf32, #tpu.memory_space<vmem>>, %arg3: memref<1x128xf32, #tpu.memory_space<vmem>>, %arg4: memref<2x128xf32, #tpu.memory_space<vmem>>, %arg5: memref<2x1xf32, #tpu.memory_space<vmem>>, %arg6: memref<2x20xf32, #tpu.memory_space<vmem>>) attributes {dimension_semantics = [#tpu.dimension_semantics<parallel>], iteration_bounds = array<i64: 1>, scalar_prefetch = 0 : i64, scratch_operands = 0 : i64, tpu.core_type = #tpu.core_type<tc>, window_params = [{transform_indices = @transform_0, window_bounds = array<i64: 20, 32>}, {pipeline_mode = #tpu.pipeline_mode<synchronous>, transform_indices = @transform_1, window_bounds = array<i64: 32, 128>}, {pipeline_mode = #tpu.pipeline_mode<synchronous>, transform_indices = @transform_2, window_bounds = array<i64: 1, 128>}, {pipeline_mode = #tpu.pipeline_mode<synchronous>, transform_indices = @transform_3, window_bounds = array<i64: 2, 128>}, {pipeline_mode = #tpu.pipeline_mode<synchronous>, transform_indices = @transform_4, window_bounds = array<i64: 2, 1>}, {transform_indices = @transform_5, window_bounds = array<i64: 2, 20>}]} {
    %c0 = arith.constant 0 : index
    %c0_0 = arith.constant 0 : index
    %0 = vector.load %arg2[%c0, %c0_0] : memref<32x128xf32, #tpu.memory_space<vmem>>, vector<32x128xf32>
    %c0_1 = arith.constant 0 : index
    %c0_2 = arith.constant 0 : index
    %1 = vector.load %arg3[%c0_1, %c0_2] : memref<1x128xf32, #tpu.memory_space<vmem>>, vector<1x128xf32>
    %c0_3 = arith.constant 0 : index
    %c0_4 = arith.constant 0 : index
    %2 = vector.load %arg4[%c0_3, %c0_4] : memref<2x128xf32, #tpu.memory_space<vmem>>, vector<2x128xf32>
    %c0_5 = arith.constant 0 : index
    %c0_6 = arith.constant 0 : index
    %3 = vector.load %arg5[%c0_5, %c0_6] : memref<2x1xf32, #tpu.memory_space<vmem>>, vector<2x1xf32>
    %c0_7 = arith.constant 0 : index
    %c0_8 = arith.constant 0 : index
    %4 = vector.load %arg1[%c0_7, %c0_8] : memref<20x32xf32, #tpu.memory_space<vmem>>, vector<20x32xf32>
    %cst = arith.constant dense<0.000000e+00> : vector<20x128xf32>
    %5 = tpu.matmul %4, %0, %cst {dimension_numbers = #tpu.dot_dimension_numbers<[1], [0], [0], [1], [0, 0, 1, 1], [], []>} : vector<20x32xf32>, vector<32x128xf32>, vector<20x128xf32> -> vector<20x128xf32>
    %6 = vector.broadcast %1 : vector<1x128xf32> to vector<20x128xf32>
    %7 = arith.addf %5, %6 : vector<20x128xf32>
    %cst_9 = arith.constant 0.000000e+00 : f32
    %8 = vector.broadcast %cst_9 : f32 to vector<20x128xf32>
    %9 = arith.maximumf %7, %8 : vector<20x128xf32>
    %cst_10 = arith.constant dense<0.000000e+00> : vector<2x20xf32>
    %10 = tpu.matmul %2, %9, %cst_10 {dimension_numbers = #tpu.dot_dimension_numbers<[1], [1], [0], [0], [0, 0, 1, 0], [], []>} : vector<2x128xf32>, vector<20x128xf32>, vector<2x20xf32> -> vector<2x20xf32>
    %11 = vector.broadcast %3 : vector<2x1xf32> to vector<2x20xf32>
    %12 = arith.addf %10, %11 : vector<2x20xf32>
    %cst_11 = arith.constant 0.000000e+00 : f32
    %13 = vector.broadcast %cst_11 : f32 to vector<2x20xf32>
    %14 = arith.maximumf %12, %13 : vector<2x20xf32>
    %15 = vector.broadcast %cst_11 : f32 to vector<2x20xf32>
    %16 = arith.subf %12, %15 : vector<2x20xf32>
    %17 = arith.cmpf one, %16, %16 : vector<2x20xf32>
    %18 = vector.broadcast %cst_11 : f32 to vector<2x20xf32>
    %19 = arith.addf %12, %18 : vector<2x20xf32>
    %20 = math.absf %16 : vector<2x20xf32>
    %cst_12 = arith.constant 0.000000e+00 : f32
    %21 = vector.broadcast %cst_12 : f32 to vector<2x20xf32>
    %22 = arith.subf %21, %20 : vector<2x20xf32>
    %23 = math.exp %22 : vector<2x20xf32>
    %24 = math.log1p %23 : vector<2x20xf32>
    %25 = arith.addf %14, %24 : vector<2x20xf32>
    %26 = arith.select %17, %19, %25 : vector<2x20xi1>, vector<2x20xf32>
    %cst_13 = arith.constant 9.99999997E-7 : f32
    %27 = vector.broadcast %cst_13 : f32 to vector<2x20xf32>
    %28 = arith.addf %26, %27 : vector<2x20xf32>
    %c0_14 = arith.constant 0 : index
    %c0_15 = arith.constant 0 : index
    %29 = vector.load %arg6[%c0_14, %c0_15] : memref<2x20xf32, #tpu.memory_space<vmem>>, vector<2x20xf32>
    tpu.vector_store %arg6[%c0_14, %c0_15], %28 {strides = array<i32>} : memref<2x20xf32, #tpu.memory_space<vmem>>, vector<2x20xf32>,
    return
  }
  func.func @transform_0(%arg0: i32) -> (i32, i32) {
    %c0_i32 = arith.constant 0 : i32
    %c0_i32_0 = arith.constant 0 : i32
    return %arg0, %c0_i32 : i32, i32
  }
  func.func @transform_1(%arg0: i32) -> (i32, i32) {
    %c0_i32 = arith.constant 0 : i32
    %c0_i32_0 = arith.constant 0 : i32
    %c0_i32_1 = arith.constant 0 : i32
    return %c0_i32, %c0_i32_0 : i32, i32
  }
  func.func @transform_2(%arg0: i32) -> (i32, i32) {
    %c0_i32 = arith.constant 0 : i32
    %c0_i32_0 = arith.constant 0 : i32
    %c0_i32_1 = arith.constant 0 : i32
    return %c0_i32, %c0_i32_0 : i32, i32
  }
  func.func @transform_3(%arg0: i32) -> (i32, i32) {
    %c0_i32 = arith.constant 0 : i32
    %c0_i32_0 = arith.constant 0 : i32
    %c0_i32_1 = arith.constant 0 : i32
    return %c0_i32, %c0_i32_0 : i32, i32
  }
  func.func @transform_4(%arg0: i32) -> (i32, i32) {
    %c0_i32 = arith.constant 0 : i32
    %c0_i32_0 = arith.constant 0 : i32
    %c0_i32_1 = arith.constant 0 : i32
    return %c0_i32, %c0_i32_0 : i32, i32
  }
  func.func @transform_5(%arg0: i32) -> (i32, i32) {
    %c0_i32 = arith.constant 0 : i32
    %c0_i32_0 = arith.constant 0 : i32
    return %c0_i32, %arg0 : i32, i32
  }
}

</mosaic_0001>

<bundles_post_ra>
// kernel: gamma_model_forward.1
= control target key start
LH: loop header
LB: loop body
LE: loop exit
PB: predicated region body
PF: predicated region fallthrough
CT: control target
= control target key end

     0   :  { %10 = vsyncpa [#allocation3], 0  ;;  %s415_s0 = inlined_call_operand.hbm [shape: f32[20,32], index: 0, kind: input, shape index: {}]   ;;  %s416_s1 = inlined_call_operand.hbm [shape: f32[32,128], index: 1, kind: input, shape index: {}]   ;;  %s417_s2 = inlined_call_operand.vmem [shape: f32[1,128], index: 2, kind: input, shape index: {}]   ;;  %s418_s3 = inlined_call_operand.vmem [shape: f32[2,128], index: 3, kind: input, shape index: {}]   ;;  %s419_s4 = inlined_call_operand.vmem [shape: f32[2,1], index: 4, kind: input, shape index: {}]   ;;  %s420_s5 = inlined_call_operand.vmem [shape: f32[2,20], index: 5, kind: output, shape index: {}]  }
   0x1   :  { %11 = vsyncpa [#allocation5], 0  ;;  %s356_s18 = smov [#allocation2]  }
   0x2   :  { %s17_s19 = sshll.u32 %s356_s18, 4  ;;  %s18_s19 = int_to_ptr.vmem [resolvable:$true] %s17_s19 }
   0x3   :  { %s320_s20 = scalar_lea.vmem %s18_s19, 384  ;;  %p325_p1 = scmp.lt.s32.totalorder %s18_s19, %s18_s19 }
   0x4   :  { %p321_p0 = scmp.ne.s32.totalorder %s18_s19, %s320_s20  ;;  %p326_p2 = scmp.lt.s32.totalorder %s320_s20, %s320_s20 }
   0x6   :  { %p327_p3 = por %p326_p2, %p325_p1 }
   0x8   :  { %p328_p4 = pnand %p327_p3, %p321_p0 }
   0xa   :  { %331 = shalt.err (!%p328_p4)
}
   0xb   :  { %s357_s21 = smov 128   ;;  %s358_s22 = smov 8  }
   0xc   :  { %23 = dma.hbm_to_vmem [thread:$0]  %s415_s0, 384, %s18_s19, [#allocation3], %s357_s21, %s357_s21, %s358_s22  }
   0xd   :  { %s359_s25 = smov [#allocation4]  }
   0xe   :  { %s29_s26 = sshll.u32 %s359_s25, 4  ;;  %s30_s26 = int_to_ptr.vmem [resolvable:$true] %s29_s26 }
   0xf   :  { %s340_s27 = scalar_lea.vmem %s30_s26, 512  ;;  %p345_p6 = scmp.lt.s32.totalorder %s30_s26, %s30_s26 }
  0x10   :  { %p341_p5 = scmp.ne.s32.totalorder %s30_s26, %s340_s27  ;;  %p346_p7 = scmp.lt.s32.totalorder %s340_s27, %s340_s27 }
  0x12   :  { %p347_p8 = por %p346_p7, %p345_p6 }
  0x14   :  { %p348_p9 = pnand %p347_p8, %p341_p5 }
  0x16   :  { %351 = shalt.err (!%p348_p9)
}
  0x17   :  { %35 = dma.hbm_to_vmem [thread:$0]  %s416_s1, 512, %s30_s26, [#allocation5], %s357_s21, %s357_s21, %s358_s22  }
  0x18   :  { %352 = dma.done.wait [#allocation3], 384  }
  0x19   :  { %353 = vsyncadd [#allocation3], 4294966912 }
  0x1a   :  { %354 = dma.done.wait [#allocation5], 512  }
  0x1b   :  { %355 = vsyncadd [#allocation5], 4294966784  ;;  %v360_v0 = vmov 0.0   ;;  %vm361_vm0 = vmmov 0   ;;  %v51_v1 = vld [vmem:[#allocation4 + $0x18] sm:$0xff]  ;;  %v50_v2 = vld [vmem:[#allocation4 + $0x10] sm:$0xff] }
  0x1c   :  { %274 = vmatprep.subr.mxu0 %v360_v0  ;;  %282 = vmatprep.mubr.msk.f32.mxu0 %vm361_vm0, %v360_v0  ;;  %v49_v3 = vld [vmem:[#allocation4 + $0x8] sm:$0xff]  ;;  %v48_v4 = vld [vmem:[#allocation4] sm:$0xff]  ;;  %vm64_vm1 = vcmask 261120   ;;  %v56_v6 = vld [vmem:[#allocation2 + $0x8] sm:$0xff]  ;;  %v362_v9 = vmov 0   ;;  %vm251_vm4 = vcmask 156672  }
  0x1d   :  { %291 = vmatprep.subr.mxu1 %v360_v0  ;;  %297 = vmatprep.mubr.msk.f32.mxu1 %vm361_vm0, %v360_v0  ;;  %v55_v5 = vld [vmem:[#allocation2] sm:$0xff]  ;;  %v57_v7 = vld [vmem:[#allocation2 + $0x10] sm:$0xf] }
  0x1e   :  { %275 = vmatpush3.msra.mxu0 %v51_v1  ;;  %v54_v8 = vld [vmem:[%s419_s4] sm:$0x3]  ;;  %307 = vset.pattern.permute.xlu0 %v362_v9 }
  0x1f   :  { %276 = vmatprep.subr.mxu0 %v360_v0  ;;  %159 = vperm.xlu0 %307, %v54_v8   ;;  %v259_v14 = vld [vmem:[%s417_s2] ss:$0 sm:$0xff] }
  0x20   :  { %277 = vmatpush3.msra.mxu0 %v50_v2  ;;  %v53_v23 = vld [vmem:[%s418_s3] sm:$0x3] }
  0x21   :  { %278 = vmatprep.subr.mxu0 %v360_v0 }
  0x22   :  { %279 = vmatpush3.msra.mxu0 %v49_v3 }
  0x23   :  { %280 = vmatprep.subr.mxu0 %v360_v0 }
  0x24   :  { %281 = vmatpush3.msra.mxu0 %v48_v4 }
  0x25   :  { %283 = vmatmul.mubr.msk.f32.vlgmr.msra.gmra.mxu0 %vm64_vm1, %v55_v5 }
  0x26   :  { %285 = vmatprep.mubr.msk.f32.mxu0 %vm361_vm0, %v360_v0 }
  0x29   :  { %286 = vmatmul.mubr.msk.f32.gmra.mxu0 %vm64_vm1, %v56_v6 }
  0x2a   :  { %288 = vmatprep.mubr.msk.f32.mxu0 %vm361_vm0, %v360_v0 }
  0x2d   :  { %289 = vmatmul.mubr.msk.f32.gmra.mxu0 %vm64_vm1, %v57_v7 }
  0x9a   :  { %v160_v24 = vpop.permute.xlu0 %159 }
  0xe5   :  { %v140_v10 = vpop.f32.mrf.mxu0 }
  0xe6   :  { %v141_v20 = vadd.f32 %v259_v14, %v140_v10 }
  0xe7   :  { %v284_v11 = vpop.f32.mrf.mxu0 }
  0xe8   :  { %v154_v22 = vmax.f32 %v141_v20, 0.0 }
  0xe9   :  { %v145_v12 = vpop.f32.mrf.mxu0 }
  0xea   :  { %v146_v18 = vadd.f32 %v259_v14, %v145_v12 }
  0xeb   :  { %v287_v13 = vpop.f32.mrf.mxu0 }
  0xec   :  { %v155_v21 = vmax.f32 %v146_v18, 0.0 }
  0xed   :  { %v150_v15 = vpop.f32.mrf.mxu0 }
  0xee   :  { %v151_v16 = vadd.f32 %v259_v14, %v150_v15 }
  0xef   :  { %v290_v17 = vpop.f32.mrf.mxu0 }
  0xf0   :  { %v156_v19 = vmax.f32 %v151_v16, 0.0 }
  0xf2   :  { %292 = vmatpush3.xpose.msra.mxu1 %v156_v19 }
  0xf3   :  { %293 = vmatprep.subr.mxu1 %v360_v0 }
  0xf6   :  { %294 = vmatpush3.xpose.msra.mxu1 %v155_v21 }
  0xf7   :  { %295 = vmatprep.subr.mxu1 %v360_v0 }
  0xfa   :  { %296 = vmatpush3.xpose.msra.mxu1 %v154_v22 }
  0xfd   :  { %298 = vmatmul.mubr.f32.vlgmr.msra.gmra.mxu1 %v53_v23 }
 0x1bd   :  { %v228_v25 = vpop.f32.mrf.mxu1 }
 0x1be   :  { %v229_v26 = vadd.f32 %v228_v25, %v160_v24 }
 0x1bf   :  { %v299_v27 = vpop.f32.mrf.mxu1 }
 0x1c0   :  { %v235_v28 = vand.u32 2147483647, %v229_v26  ;;  %v232_v39 = vmax.f32 %v229_v26, 0.0  ;;  %vm233_vm3 = vcmp.ne.f32.partialorder %v229_v26, %v229_v26 }
 0x1c2   :  { %v236_v29 = vsub.f32 0.0, %v235_v28 }
 0x1c4   :  { %v237_v30 = vmul.f32 1.442695, %v236_v29 }
 0x1c6   :  { %308 = vpow2.f32 %v237_v30 }
 0x1d3   :  { %v309_v31 = vpop.eup %308 }
 0x1d4   :  { %v239_v32 = vadd.f32 1.0, %v309_v31  ;;  %v242_v33 = vmul.f32 -0.5, %v309_v31  ;;  %v245_v35 = vand.u32 2147483647, %v309_v31 }
 0x1d6   :  { %310 = vlog2.f32 %v239_v32  ;;  %v243_v34 = vadd.f32 1.0, %v242_v33  ;;  %vm246_vm2 = vcmp.lt.f32.partialorder %v245_v35, 0.0004427343 }
 0x1d8   :  { %v244_v38 = vmul.f32 %v309_v31, %v243_v34 }
 0x1e3   :  { %v311_v36 = vpop.eup %310 }
 0x1e4   :  { %v241_v37 = vmul.f32 0.6931472, %v311_v36 }
 0x1e6   :  { %v247_v40 = vsel %vm246_vm2, %v244_v38, %v241_v37 }
 0x1e7   :  { %v248_v41 = vadd.f32 %v247_v40, %v232_v39 }
 0x1e9   :  { %v249_v42 = vsel %vm233_vm3, %v229_v26, %v248_v41 }
 0x1ea   :  { %v250_v43 = vadd.f32 1e-06, %v249_v42 }
 0x1ec   :  { %252 = vst.msk [vmem:[%s420_s5] sm:$0x3] %vm251_vm4, %v250_v43 }
 0x1ed   :  { %257 = vsyncpa [#allocation3], 1 }
 0x1ee   :  { %258 = vsyncpa [#allocation5], 1 }

</bundles_post_ra>
